<compile_context>
chip_gen: v5e
topology: v5e:2x2
jax: 0.10.0
libtpu: 0.0.40
codegen_flags: <defaults>
</compile_context>

<pallas_src>
import functools
import jax
import jax.numpy as jnp
from jax.experimental import pallas as pl
from jax.experimental.pallas import tpu as pltpu


def _round_up(x, m):
    return ((x + m - 1) // m) * m


# Elementwise (bias/ReLU) dtype: bf16 on chips with a bf16 VPU (v6e / v7x),
# f32 elsewhere (v5e and older).  Decided once at import, used as a static.
def _pick_ew_dtype():
    try:
        kind = jax.devices()[0].device_kind.lower()
    except Exception:  # pragma: no cover - e.g. uninitialized backend
        return jnp.float32
    return jnp.bfloat16 if ("v6" in kind or "v7" in kind) else jnp.float32


_EW_DTYPE = _pick_ew_dtype()


# --------------------------------------------------------------------------
# Pallas kernel: fused  (x @ W1 + b1) -> ReLU -> (@ W2 + b2)
#   x  : (tm, H)  f32 (cast to bf16 in-kernel)
#   W1 : (H, U)   bf16     b1 : (1, U)  f32
#   W2 : (U, Lp)  bf16     b2 : (1, Lp) f32
#   out: (tm, Lp) f32
# --------------------------------------------------------------------------
def slot_head_kernel(x_ref, w1_ref, b1_ref, w2_ref, b2_ref, o_ref, *, ew_dtype):
    # In-kernel bf16 cast of the activation tile (VPU cast hides under the MXU;
    # avoids a wrapper-side HBM round-trip over x).
    xb = x_ref[...].astype(jnp.bfloat16)
    # MXU matmul in bf16 with f32 accumulation.
    h = jnp.dot(xb, w1_ref[...], preferred_element_type=jnp.float32)
    # Bias + ReLU in ew_dtype (bf16 on v6e/v7x, f32 on v5e).
    h = jnp.maximum(h.astype(ew_dtype) + b1_ref[...].astype(ew_dtype), 0.0)
    o = jnp.dot(h.astype(jnp.bfloat16), w2_ref[...],
                preferred_element_type=jnp.float32)
    # Output kept f32; switch out_shape + this cast to bf16 if downstream
    # tolerance allows (halves writeback traffic).
    o_ref[...] = (o + b2_ref[...]).astype(o_ref.dtype)


@functools.partial(jax.jit, static_argnames=("tm",))
def slot_head(x, w1, b1, w2, b2, *, tm=512):
    """x: (M, H) tokens f32;  w1: (H, U), b1: (1, U), w2: (U, L), b2: (1, L).

    Returns (M, L) f32 logits. Internally pads M to a multiple of the token
    tile and L to a multiple of 128 (lane-dense output), then slices back.
    """
    M, H = x.shape
    U = w1.shape[1]
    L = w2.shape[1]

    # Lane-dense output: pad label dim up to a multiple of 128.
    # TODO(synk): if L ever exceeds 128, round to 256 on v6e/v7x (256-wide MXU).
    Lp = _round_up(max(L, 128), 128)

    # Token tile: multiple of 16 (bf16 sublane packing of the in-kernel cast),
    # and clamped so the row grid has >= 2 steps whenever M allows — on v7x
    # the "parallel" row axis shards across both TensorCores; on 1-TC chips
    # the extra grid step costs ~0.35 us (negligible).
    tm = _round_up(max(int(tm), 16), 16)
    tm = min(tm, max(16, _round_up(pl.cdiv(M, 2), 16)))
    Mp = _round_up(M, tm)

    if Mp != M:
        # TODO(synk): replace with a ragged last tile / masked store to avoid
        # this extra pass over x when M is not a tile multiple.
        x = jnp.pad(x, ((0, Mp - M), (0, 0)))
    if Lp != L:
        # Keep w2 / b2 pads coupled: padded columns stay exactly zero.
        w2 = jnp.pad(w2, ((0, 0), (0, Lp - L)))
        b2 = jnp.pad(b2, ((0, 0), (0, Lp - L)))

    xf = x.astype(jnp.float32)            # activations stay f32 (cast in-kernel)
    w1b = w1.astype(jnp.bfloat16)         # small, grid-invariant weights: bf16
    w2b = w2.astype(jnp.bfloat16)
    b1f = b1.astype(jnp.float32)
    b2f = b2.astype(jnp.float32)

    cost = pl.CostEstimate(
        flops=2 * Mp * H * U + 2 * Mp * U * Lp,
        transcendentals=0,
        bytes_accessed=(Mp * H * 4 + H * U * 2 + U * 4
                        + U * Lp * 2 + Lp * 4 + Mp * Lp * 4),
    )

    kernel = functools.partial(slot_head_kernel, ew_dtype=_EW_DTYPE)

    out = pl.pallas_call(
        kernel,
        out_shape=jax.ShapeDtypeStruct((Mp, Lp), jnp.float32),
        grid_spec=pltpu.PrefetchScalarGridSpec(
            num_scalar_prefetch=0,
            grid=(Mp // tm,),
            in_specs=[
                pl.BlockSpec((tm, H), lambda i: (i, 0)),   # token tile (f32)
                pl.BlockSpec((H, U), lambda i: (0, 0)),    # W1 (grid-invariant)
                pl.BlockSpec((1, U), lambda i: (0, 0)),    # b1 (f32)
                pl.BlockSpec((U, Lp), lambda i: (0, 0)),   # W2 (grid-invariant)
                pl.BlockSpec((1, Lp), lambda i: (0, 0)),   # b2 (f32)
            ],
            out_specs=pl.BlockSpec((tm, Lp), lambda i: (i, 0)),
        ),
        compiler_params=pltpu.CompilerParams(
            dimension_semantics=("parallel",),        # row-grid shards over TCs
            vmem_limit_bytes=32 * 1024 * 1024,        # explicit, fits v5e/v6e/v7x
        ),
        cost_estimate=cost,
    )(xf, w1b, b1f, w2b, b2f)
    return out[:M, :L]


# --------------------------------------------------------------------------
# Synthetic deterministic single-layer "BERT" encoder (plain JAX glue).
# --------------------------------------------------------------------------
def layer_norm(x, eps=1e-12):
    mu = jnp.mean(x, axis=-1, keepdims=True)
    var = jnp.var(x, axis=-1, keepdims=True)
    return (x - mu) / jnp.sqrt(var + eps)


def tiny_bert_encoder(ids, mask, p):
    """ids: (B, T) int32, mask: (B, T) float32 -> (seq_out (B,T,H), pooled (B,H))."""
    B, T = ids.shape
    x = p["tok_emb"][ids] + p["pos_emb"][None, :T, :]
    x = layer_norm(x)

    # single-head self-attention
    q = x @ p["wq"]
    k = x @ p["wk"]
    v = x @ p["wv"]
    H = q.shape[-1]
    att = jnp.einsum("bqd,bkd->bqk", q, k) / jnp.sqrt(jnp.float32(H))
    att = att + (1.0 - mask)[:, None, :] * (-1e9)
    att = jax.nn.softmax(att, axis=-1)
    ctx = jnp.einsum("bqk,bkd->bqd", att, v)
    x = layer_norm(x + ctx @ p["wo"])

    ffn = jax.nn.relu(x @ p["w_ff1"] + p["b_ff1"]) @ p["w_ff2"] + p["b_ff2"]
    seq_out = layer_norm(x + ffn)

    pooled = jnp.tanh(seq_out[:, 0, :] @ p["w_pool"] + p["b_pool"])
    return seq_out, pooled


# --------------------------------------------------------------------------
# slotbert forward (inference): encoder -> fused Pallas slot head.
# --------------------------------------------------------------------------
def slotbert_forward(ids, mask, enc_params, head_params):
    B, T = ids.shape
    seq_out, pooled = tiny_bert_encoder(ids, mask, enc_params)     # (B,T,H), (B,H)
    H = seq_out.shape[-1]
    x = seq_out.reshape(B * T, H)
    logits = slot_head(
        x,
        head_params["w1"], head_params["b1"],
        head_params["w2"], head_params["b2"],
        tm=512,
    )
    L = head_params["w2"].shape[1]
    slot_logits = logits.reshape(B, T, L)
    # pooled_output only passes through dropout (identity at inference) and
    # is not returned by the reference forward; kept for shape fidelity.
    del pooled
    return (slot_logits,)


# --------------------------------------------------------------------------
# Deterministic parameter init + demo.
# --------------------------------------------------------------------------
def make_params(key, vocab_size, T, H, U, L):
    ks = jax.random.split(key, 16)
    s = 0.02
    enc = {
        "tok_emb": s * jax.random.normal(ks[0], (vocab_size, H), jnp.float32),
        "pos_emb": s * jax.random.normal(ks[1], (T, H), jnp.float32),
        "wq": s * jax.random.normal(ks[2], (H, H), jnp.float32),
        "wk": s * jax.random.normal(ks[3], (H, H), jnp.float32),
        "wv": s * jax.random.normal(ks[4], (H, H), jnp.float32),
        "wo": s * jax.random.normal(ks[5], (H, H), jnp.float32),
        "w_ff1": s * jax.random.normal(ks[6], (H, 2 * H), jnp.float32),
        "b_ff1": jnp.zeros((2 * H,), jnp.float32),
        "w_ff2": s * jax.random.normal(ks[7], (2 * H, H), jnp.float32),
        "b_ff2": jnp.zeros((H,), jnp.float32),
        "w_pool": s * jax.random.normal(ks[8], (H, H), jnp.float32),
        "b_pool": jnp.zeros((H,), jnp.float32),
    }
    head = {
        # nn.Linear(bert.hidden_size, hidden_units)  -> (H, U)
        "w1": s * jax.random.normal(ks[9], (H, U), jnp.float32),
        "b1": 0.01 * jnp.ones((1, U), jnp.float32),
        # nn.Linear(hidden_units, intent_dim)        -> (U, L)
        "w2": s * jax.random.normal(ks[10], (U, L), jnp.float32),
        "b2": 0.01 * jnp.ones((1, L), jnp.float32),
    }
    return enc, head


if __name__ == "__main__":
    # Small shapes consistent with the module (scaled-down BERT):
    B, T = 2, 8            # batch, sequence length
    H = 128                # bert hidden size (scaled down from 768)
    U = 128                # self.hidden_units (scaled down from 768)
    L = 16                 # intent_dim = len(vocab_datas) (synthetic)
    vocab_size = 32

    key = jax.random.PRNGKey(0)
    k_ids, k_params = jax.random.split(key)
    ids = jax.random.randint(k_ids, (B, T), 0, vocab_size, dtype=jnp.int32)
    mask = jnp.ones((B, T), jnp.float32)

    enc_params, head_params = make_params(k_params, vocab_size, T, H, U, L)

    (slot_logits,) = slotbert_forward(ids, mask, enc_params, head_params)
    slot_logits = jax.block_until_ready(slot_logits)

    # Reference check of the Pallas head against plain JAX (f32 reference;
    # tolerance loosened because the kernel uses bf16 matmul inputs).
    seq_out, _ = tiny_bert_encoder(ids, mask, enc_params)
    x = seq_out.reshape(B * T, H)
    ref = jnp.maximum(x @ head_params["w1"] + head_params["b1"], 0.0)
    ref = (ref @ head_params["w2"] + head_params["b2"]).reshape(B, T, L)
    assert slot_logits.shape == (B, T, L)
    assert jnp.allclose(slot_logits, ref, atol=1e-2, rtol=1e-2)

    print("KERNEL_OK")
</pallas_src>

<mosaic_0001>
module attributes {stable_mosaic.version = 11 : i64} {
  func.func @slot_head_kernel(%arg0: i32, %arg1: memref<16x128xf32, #tpu.memory_space<vmem>>, %arg2: memref<128x128xbf16, #tpu.memory_space<vmem>>, %arg3: memref<1x128xf32, #tpu.memory_space<vmem>>, %arg4: memref<128x128xbf16, #tpu.memory_space<vmem>>, %arg5: memref<1x128xf32, #tpu.memory_space<vmem>>, %arg6: memref<16x128xf32, #tpu.memory_space<vmem>>) attributes {dimension_semantics = [#tpu.dimension_semantics<parallel>], iteration_bounds = array<i64: 1>, scalar_prefetch = 0 : i64, scratch_operands = 0 : i64, tpu.core_type = #tpu.core_type<tc>, window_params = [{transform_indices = @transform_0, window_bounds = array<i64: 16, 128>}, {pipeline_mode = #tpu.pipeline_mode<synchronous>, transform_indices = @transform_1, window_bounds = array<i64: 128, 128>}, {pipeline_mode = #tpu.pipeline_mode<synchronous>, transform_indices = @transform_2, window_bounds = array<i64: 1, 128>}, {pipeline_mode = #tpu.pipeline_mode<synchronous>, transform_indices = @transform_3, window_bounds = array<i64: 128, 128>}, {pipeline_mode = #tpu.pipeline_mode<synchronous>, transform_indices = @transform_4, window_bounds = array<i64: 1, 128>}, {transform_indices = @transform_5, window_bounds = array<i64: 16, 128>}]} {
    %c0 = arith.constant 0 : index
    %c0_0 = arith.constant 0 : index
    %0 = vector.load %arg1[%c0, %c0_0] : memref<16x128xf32, #tpu.memory_space<vmem>>, vector<16x128xf32>
    %1 = arith.truncf %0 : vector<16x128xf32> to vector<16x128xbf16>
    %c0_1 = arith.constant 0 : index
    %c0_2 = arith.constant 0 : index
    %2 = vector.load %arg2[%c0_1, %c0_2] : memref<128x128xbf16, #tpu.memory_space<vmem>>, vector<128x128xbf16>
    %cst = arith.constant dense<0.000000e+00> : vector<16x128xf32>
    %3 = tpu.matmul %1, %2, %cst {dimension_numbers = #tpu.dot_dimension_numbers<[1], [0], [0], [1], [0, 0, 1, 1], [], []>} : vector<16x128xbf16>, vector<128x128xbf16>, vector<16x128xf32> -> vector<16x128xf32>
    %c0_3 = arith.constant 0 : index
    %c0_4 = arith.constant 0 : index
    %4 = vector.load %arg3[%c0_3, %c0_4] : memref<1x128xf32, #tpu.memory_space<vmem>>, vector<1x128xf32>
    %5 = vector.broadcast %4 : vector<1x128xf32> to vector<16x128xf32>
    %6 = arith.addf %3, %5 : vector<16x128xf32>
    %cst_5 = arith.constant 0.000000e+00 : f32
    %7 = vector.broadcast %cst_5 : f32 to vector<16x128xf32>
    %8 = arith.maximumf %6, %7 : vector<16x128xf32>
    %9 = arith.truncf %8 : vector<16x128xf32> to vector<16x128xbf16>
    %c0_6 = arith.constant 0 : index
    %c0_7 = arith.constant 0 : index
    %10 = vector.load %arg4[%c0_6, %c0_7] : memref<128x128xbf16, #tpu.memory_space<vmem>>, vector<128x128xbf16>
    %cst_8 = arith.constant dense<0.000000e+00> : vector<16x128xf32>
    %11 = tpu.matmul %9, %10, %cst_8 {dimension_numbers = #tpu.dot_dimension_numbers<[1], [0], [0], [1], [0, 0, 1, 1], [], []>} : vector<16x128xbf16>, vector<128x128xbf16>, vector<16x128xf32> -> vector<16x128xf32>
    %c0_9 = arith.constant 0 : index
    %c0_10 = arith.constant 0 : index
    %12 = vector.load %arg5[%c0_9, %c0_10] : memref<1x128xf32, #tpu.memory_space<vmem>>, vector<1x128xf32>
    %13 = vector.broadcast %12 : vector<1x128xf32> to vector<16x128xf32>
    %14 = arith.addf %11, %13 : vector<16x128xf32>
    %c0_11 = arith.constant 0 : index
    %c0_12 = arith.constant 0 : index
    %15 = vector.load %arg6[%c0_11, %c0_12] : memref<16x128xf32, #tpu.memory_space<vmem>>, vector<16x128xf32>
    tpu.vector_store %arg6[%c0_11, %c0_12], %14 {strides = array<i32>} : memref<16x128xf32, #tpu.memory_space<vmem>>, vector<16x128xf32>,
    return
  }
  func.func @transform_0(%arg0: i32) -> (i32, i32) {
    %c0_i32 = arith.constant 0 : i32
    %c0_i32_0 = arith.constant 0 : i32
    return %arg0, %c0_i32 : i32, i32
  }
  func.func @transform_1(%arg0: i32) -> (i32, i32) {
    %c0_i32 = arith.constant 0 : i32
    %c0_i32_0 = arith.constant 0 : i32
    %c0_i32_1 = arith.constant 0 : i32
    return %c0_i32, %c0_i32_0 : i32, i32
  }
  func.func @transform_2(%arg0: i32) -> (i32, i32) {
    %c0_i32 = arith.constant 0 : i32
    %c0_i32_0 = arith.constant 0 : i32
    %c0_i32_1 = arith.constant 0 : i32
    return %c0_i32, %c0_i32_0 : i32, i32
  }
  func.func @transform_3(%arg0: i32) -> (i32, i32) {
    %c0_i32 = arith.constant 0 : i32
    %c0_i32_0 = arith.constant 0 : i32
    %c0_i32_1 = arith.constant 0 : i32
    return %c0_i32, %c0_i32_0 : i32, i32
  }
  func.func @transform_4(%arg0: i32) -> (i32, i32) {
    %c0_i32 = arith.constant 0 : i32
    %c0_i32_0 = arith.constant 0 : i32
    %c0_i32_1 = arith.constant 0 : i32
    return %c0_i32, %c0_i32_0 : i32, i32
  }
  func.func @transform_5(%arg0: i32) -> (i32, i32) {
    %c0_i32 = arith.constant 0 : i32
    %c0_i32_0 = arith.constant 0 : i32
    return %arg0, %c0_i32 : i32, i32
  }
}

</mosaic_0001>

<bundles_post_ra>
// kernel: slot_head.1
= control target key start
LH: loop header
LB: loop body
LE: loop exit
PB: predicated region body
PF: predicated region fallthrough
CT: control target
= control target key end

     0   :  { %s418_s0 = inlined_call_operand.vmem [shape: f32[16,128], index: 0, kind: input, shape index: {}]   ;;  %s419_s1 = inlined_call_operand.vmem [shape: bf16[128,128], index: 1, kind: input, shape index: {}]   ;;  %s420_s2 = inlined_call_operand.vmem [shape: f32[1,128], index: 2, kind: input, shape index: {}]   ;;  %s421_s3 = inlined_call_operand.vmem [shape: bf16[128,128], index: 3, kind: input, shape index: {}]   ;;  %s422_s4 = inlined_call_operand.vmem [shape: f32[1,128], index: 4, kind: input, shape index: {}]   ;;  %s423_s5 = inlined_call_operand.hbm [shape: f32[16,128], index: 5, kind: output, shape index: {}]  }
   0x1   :  { %v282_v0 = vld [vmem:[%s419_s1 + $0x38] sm:$0xff]  ;;  %v281_v1 = vld [vmem:[%s419_s1 + $0x30] sm:$0xff] }
   0x2   :  { %92 = vmatpush.bf16.msra.mxu0 %v282_v0  ;;  %v290_v2 = vld [vmem:[%s421_s3 + $0x38] sm:$0xff]  ;;  %v289_v3 = vld [vmem:[%s421_s3 + $0x30] sm:$0xff] }
   0x3   :  { %177 = vmatpush.bf16.msra.mxu1 %v290_v2 }
   0x4   :  { %10 = vsyncpa [#allocation3], 0  ;;  %v280_v4 = vld [vmem:[%s419_s1 + $0x28] sm:$0xff]  ;;  %v279_v6 = vld [vmem:[%s419_s1 + $0x20] sm:$0xff]  ;;  %s323_s9 = smov 128   ;;  %s324_s10 = smov 8  }
   0x5   :  { %v288_v5 = vld [vmem:[%s421_s3 + $0x28] sm:$0xff]  ;;  %v287_v7 = vld [vmem:[%s421_s3 + $0x20] sm:$0xff]  ;;  %v278_v8 = vld [vmem:[%s419_s1 + $0x18] sm:$0xff] }
   0x6   :  { %93 = vmatpush.bf16.msra.mxu0 %v281_v1  ;;  %v277_v9 = vld [vmem:[%s419_s1 + $0x10] sm:$0xff]  ;;  %v276_v10 = vld [vmem:[%s419_s1 + $0x8] sm:$0xff]  ;;  %v275_v11 = vld [vmem:[%s419_s1] sm:$0xff] }
   0x7   :  { %178 = vmatpush.bf16.msra.mxu1 %v289_v3  ;;  %v21_v12 = vld [vmem:[%s418_s0] sm:$0xff]  ;;  %v22_v13 = vld [vmem:[%s418_s0 + $0x8] sm:$0xff]  ;;  %v286_v15 = vld [vmem:[%s421_s3 + $0x18] sm:$0xff] }
   0x8   :  { %v23_v14 = vpack.c.bf16 %v22_v13, %v21_v12  ;;  %v285_v16 = vld [vmem:[%s421_s3 + $0x10] sm:$0xff]  ;;  %v284_v17 = vld [vmem:[%s421_s3 + $0x8] sm:$0xff]  ;;  %v283_v18 = vld [vmem:[%s421_s3] sm:$0xff]  ;;  %s322_s3 = smov [#allocation2]  }
   0x9   :  { %v294_v20 = vld [vmem:[%s420_s2] ss:$0 sm:$0xff]  ;;  %s197_s6 = sshll.u32 %s322_s3, 4  ;;  %s199_s2 = sshll.u32 %s423_s5, 4  ;;  %s198_s6 = int_to_ptr.vmem [resolvable:$true] %s197_s6  ;;  %s200_s2 = int_to_ptr.hbm [resolvable:$true] %s199_s2 }
   0xa   :  { %94 = vmatpush.bf16.msra.mxu0 %v280_v4  ;;  %v295_v27 = vld [vmem:[%s422_s4] ss:$0 sm:$0xff] }
   0xb   :  { %179 = vmatpush.bf16.msra.mxu1 %v288_v5 }
   0xe   :  { %95 = vmatpush.bf16.msra.mxu0 %v279_v6 }
   0xf   :  { %180 = vmatpush.bf16.msra.mxu1 %v287_v7 }
  0x12   :  { %96 = vmatpush.bf16.msra.mxu0 %v278_v8 }
  0x13   :  { %181 = vmatpush.bf16.msra.mxu1 %v286_v15 }
  0x16   :  { %97 = vmatpush.bf16.msra.mxu0 %v277_v9 }
  0x17   :  { %182 = vmatpush.bf16.msra.mxu1 %v285_v16 }
  0x1a   :  { %98 = vmatpush.bf16.msra.mxu0 %v276_v10 }
  0x1b   :  { %183 = vmatpush.bf16.msra.mxu1 %v284_v17 }
  0x1e   :  { %99 = vmatpush.bf16.msra.mxu0 %v275_v11 }
  0x1f   :  { %184 = vmatpush.bf16.msra.mxu1 %v283_v18 }
  0x21   :  { %100 = vmatmul.bf16.vlgmr.msra.gmra.mxu0 %v23_v14 }
  0x9e   :  { %v101_v19 = vpop.f32.mrf.mxu0 }
  0x9f   :  { %v102_v21 = vadd.f32 %v294_v20, %v101_v19 }
  0xa1   :  { %v106_v24 = vmax.f32 %v102_v21, 0.0 }
  0xa6   :  { %v103_v22 = vpop.f32.mrf.mxu0 }
  0xa7   :  { %v104_v23 = vadd.f32 %v294_v20, %v103_v22 }
  0xa9   :  { %v107_v25 = vmax.f32 %v104_v23, 0.0 }
  0xab   :  { %v108_v26 = vpack.c.bf16 %v107_v25, %v106_v24 }
  0xad   :  { %185 = vmatmul.bf16.vlgmr.msra.gmra.mxu1 %v108_v26 }
 0x12a   :  { %v186_v28 = vpop.f32.mrf.mxu1 }
 0x12b   :  { %v187_v29 = vadd.f32 %v295_v27, %v186_v28 }
 0x12d   :  { %191 = vst [vmem:[#allocation2] sm:$0xff] %v187_v29 }
 0x132   :  { %v188_v30 = vpop.f32.mrf.mxu1 }
 0x133   :  { %v189_v31 = vadd.f32 %v295_v27, %v188_v30 }
 0x135   :  { %192 = vst [vmem:[#allocation2 + $0x8] sm:$0xff] %v189_v31 }
 0x136   :  { %205 = dma.vmem_to_hbm [thread:$0]  %s198_s6, 256, %s200_s2, [#allocation3], %s323_s9, %s323_s9, %s324_s10  }
 0x137   :  { %320 = dma.done.wait [#allocation3], 256  }
 0x138   :  { %321 = vsyncadd [#allocation3], 4294967040 }
 0x139   :  { %210 = vsyncpa [#allocation3], 1 }

</bundles_post_ra>
